<compile_context>
chip_gen: v7x
topology: tpu7x:2x2x1
jax: 0.10.0
libtpu: 0.0.40
codegen_flags: <defaults>
</compile_context>

<pallas_src>
import functools

import jax
import jax.numpy as jnp
from jax.experimental import pallas as pl
from jax.experimental.pallas import tpu as pltpu

GAMMA = 1.5   # compile-time constant; modulating factor computed as m*sqrt(m)
ALPHA = 0.25
LANES = 128
SUBLANES = 8


def _focal_loss_kernel(pred_ref, true_ref, out_ref, *, valid_rows):
    c = pl.program_id(0)                 # split index (parallel)
    s = pl.program_id(1)                 # reduction step (arbitrary, last)
    steps = pl.num_programs(1)
    block = c * steps + s                # global block index

    @pl.when(s == 0)
    def _():
        out_ref[...] = jnp.zeros_like(out_ref)

    x = pred_ref[...].astype(jnp.float32)
    y = true_ref[...].astype(jnp.float32)
    tr, lanes = x.shape

    # Shared transcendental: e = exp(-|x|)
    e = jnp.exp(-jnp.abs(x))

    # BCEWithLogitsLoss(reduction='none'), numerically stable:
    #   max(x, 0) - x*y + log(1 + exp(-|x|))
    bce = jnp.maximum(x, 0.0) - x * y + jnp.log1p(e)

    # sigmoid(x) from the same e. Approx EUP reciprocal + 1 Newton step.
    d = 1.0 + e
    inv = pl.reciprocal(d, approx=True)
    inv = inv * (2.0 - d * inv)                       # NR refinement (~1e-7)
    sig = jnp.where(x >= 0.0, inv, e * inv)

    # Folded algebra:
    #   alpha_factor = y*a + (1-y)*(1-a) = (1-a) + y*(2a-1)
    #   m = 1 - p_t  = y + sig - 2*y*sig   (clamped >= 0 for the sqrt)
    alpha_factor = (1.0 - ALPHA) + y * (2.0 * ALPHA - 1.0)
    m = jnp.maximum(y + sig - 2.0 * y * sig, 0.0)
    loss = bce * alpha_factor * (m * jnp.sqrt(m))     # m ** GAMMA, GAMMA=1.5

    def _accum(vals):
        # vreg-shaped partial sum: cheap VPU adds, no per-step scalar reduce.
        part = vals.reshape(tr // SUBLANES, SUBLANES, lanes).sum(axis=0)
        out_ref[...] += part[None, :, :]

    # Only blocks overhanging the array (Pallas edge blocks hold unspecified
    # data past `valid_rows`) pay for the iota + mask.
    needs_mask = (block + 1) * tr > valid_rows

    @pl.when(needs_mask)
    def _():
        row = jax.lax.broadcasted_iota(jnp.int32, (tr, lanes), 0)
        keep = (block * tr + row) < valid_rows
        _accum(jnp.where(keep, loss, 0.0))

    @pl.when(jnp.logical_not(needs_mask))
    def _():
        _accum(loss)


def focal_loss(pred, true, *, tile_rows=8192, num_splits=2):
    """pred, true: same-shaped float arrays (logits / targets, any layout).

    Returns the scalar mean focal loss (reduction='mean': the default of the
    BCEWithLogitsLoss wrapped by the PyTorch module).
    """
    assert pred.shape == true.shape
    total = pred.size

    flat_p = pred.reshape(-1)
    flat_t = true.reshape(-1)

    rem = total % LANES
    if rem:
        # Rare misaligned case: pad the <128-element tail with loss-neutral
        # values (pred=+80, true=1 => per-element loss ~ 0), so no masking of
        # these elements is ever needed.
        # TODO(synk): handle the tiny tail separately to avoid this copy.
        pad = LANES - rem
        flat_p = jnp.pad(flat_p, (0, pad), constant_values=80.0)
        flat_t = jnp.pad(flat_t, (0, pad), constant_values=1.0)

    rows = pl.cdiv(total, LANES)

    # bf16/fp8 inputs need 16/32-row block alignment; f32 needs 8.
    itemsize = min(jnp.dtype(pred.dtype).itemsize, jnp.dtype(true.dtype).itemsize)
    row_align = SUBLANES * max(1, 4 // max(itemsize, 1))

    # Split across TensorCores only when the input is big enough for each
    # split to own at least a few aligned row-groups (v7x megacore); on
    # small/medium inputs a single larger block wins on single-TC parts.
    if rows < num_splits * row_align * 4:
        num_splits = 1

    per_split = pl.cdiv(rows, num_splits)
    tr = max(row_align,
             min(tile_rows, pl.cdiv(per_split, row_align) * row_align))
    steps = pl.cdiv(rows, tr * num_splits)

    pred2d = flat_p.reshape(rows, LANES)
    true2d = flat_t.reshape(rows, LANES)

    kernel = functools.partial(_focal_loss_kernel, valid_rows=rows)

    partials = pl.pallas_call(
        kernel,
        out_shape=jax.ShapeDtypeStruct((num_splits, SUBLANES, LANES),
                                       jnp.float32),
        grid_spec=pltpu.PrefetchScalarGridSpec(
            num_scalar_prefetch=0,
            grid=(num_splits, steps),
            in_specs=[
                pl.BlockSpec((tr, LANES), lambda c, s: (c * steps + s, 0)),
                pl.BlockSpec((tr, LANES), lambda c, s: (c * steps + s, 0)),
            ],
            out_specs=pl.BlockSpec((1, SUBLANES, LANES),
                                   lambda c, s: (c, 0, 0)),
        ),
        compiler_params=pltpu.CompilerParams(
            dimension_semantics=("parallel", "arbitrary"),
            vmem_limit_bytes=48 * 1024 * 1024,
        ),
    )(pred2d, true2d)

    # reduction == 'mean': tiny final reduce over the per-split vregs.
    return jnp.sum(partials) / jnp.float32(total)


def _reference_focal_loss(pred, true):
    """Pure-JAX reference matching the PyTorch module exactly."""
    x = pred.astype(jnp.float32)
    y = true.astype(jnp.float32)
    bce = jnp.maximum(x, 0.0) - x * y + jnp.log1p(jnp.exp(-jnp.abs(x)))
    p = jax.nn.sigmoid(x)
    p_t = y * p + (1.0 - y) * (1.0 - p)
    alpha_factor = y * ALPHA + (1.0 - y) * (1.0 - ALPHA)
    mod = (1.0 - p_t) ** GAMMA
    return jnp.mean(bce * alpha_factor * mod)


def _check(shape, key):
    k1, k2 = jax.random.split(key)
    pred = jax.random.normal(k1, shape, dtype=jnp.float32) * 2.0
    true = (jax.random.uniform(k2, shape) > 0.5).astype(jnp.float32)
    out = jax.block_until_ready(focal_loss(pred, true))
    ref = _reference_focal_loss(pred, true)
    assert jnp.allclose(out, ref, rtol=1e-4, atol=1e-7), (shape, out, ref)


if __name__ == "__main__":
    key = jax.random.PRNGKey(0)
    k0, k1, k2 = jax.random.split(key, 3)

    # Main small NCHW case (aligned fast path, single split).
    _check((2, 4, 16, 16), k0)
    # Misaligned total (945 elements): loss-neutral tail pad + edge-block mask.
    _check((3, 5, 7, 9), k1)
    # Larger case exercising the 2-way split (parallel leading grid axis).
    _check((2, 3, 64, 64), k2)

    print("KERNEL_OK")
</pallas_src>

<mosaic_0001>
module attributes {stable_mosaic.version = 11 : i64} {
  func.func @_focal_loss_kernel(%arg0: i32, %arg1: i32, %arg2: memref<16x128xf32, #tpu.memory_space<vmem>>, %arg3: memref<16x128xf32, #tpu.memory_space<vmem>>, %arg4: memref<1x8x128xf32, #tpu.memory_space<vmem>>) attributes {dimension_semantics = [#tpu.dimension_semantics<parallel>, #tpu.dimension_semantics<arbitrary>], iteration_bounds = array<i64: 1, 1>, scalar_prefetch = 0 : i64, scratch_operands = 0 : i64, tpu.core_type = #tpu.core_type<tc>, window_params = [{transform_indices = @transform_0, window_bounds = array<i64: 16, 128>}, {transform_indices = @transform_1, window_bounds = array<i64: 16, 128>}, {transform_indices = @transform_2, window_bounds = array<i64: 1, 8, 128>}]} {
    %c1_i32 = arith.constant 1 : i32
    %0 = arith.muli %arg0, %c1_i32 : i32
    %1 = arith.addi %0, %arg1 : i32
    %c0_i32 = arith.constant 0 : i32
    %2 = arith.cmpi eq, %arg1, %c0_i32 : i32
    %3 = arith.extui %2 : i1 to i32
    %c0_i32_0 = arith.constant 0 : i32
    %4 = arith.cmpi ne, %3, %c0_i32_0 : i32
    scf.if %4 {
      %cst_16 = arith.constant 0.000000e+00 : f32
      %51 = vector.broadcast %cst_16 : f32 to vector<1x8x128xf32>
      %c0_17 = arith.constant 0 : index
      %c0_18 = arith.constant 0 : index
      %c0_19 = arith.constant 0 : index
      %52 = vector.load %arg4[%c0_17, %c0_18, %c0_19] : memref<1x8x128xf32, #tpu.memory_space<vmem>>, vector<1x8x128xf32>
      tpu.vector_store %arg4[%c0_17, %c0_18, %c0_19], %51 {strides = array<i32>} : memref<1x8x128xf32, #tpu.memory_space<vmem>>, vector<1x8x128xf32>,
    } else {
    }
    %c0 = arith.constant 0 : index
    %c0_1 = arith.constant 0 : index
    %5 = vector.load %arg2[%c0, %c0_1] : memref<16x128xf32, #tpu.memory_space<vmem>>, vector<16x128xf32>
    %c0_2 = arith.constant 0 : index
    %c0_3 = arith.constant 0 : index
    %6 = vector.load %arg3[%c0_2, %c0_3] : memref<16x128xf32, #tpu.memory_space<vmem>>, vector<16x128xf32>
    %7 = math.absf %5 : vector<16x128xf32>
    %cst = arith.constant 0.000000e+00 : f32
    %8 = vector.broadcast %cst : f32 to vector<16x128xf32>
    %9 = arith.subf %8, %7 : vector<16x128xf32>
    %10 = math.exp %9 : vector<16x128xf32>
    %cst_4 = arith.constant 0.000000e+00 : f32
    %11 = vector.broadcast %cst_4 : f32 to vector<16x128xf32>
    %12 = arith.maximumf %5, %11 : vector<16x128xf32>
    %13 = arith.mulf %5, %6 : vector<16x128xf32>
    %14 = arith.subf %12, %13 : vector<16x128xf32>
    %15 = math.log1p %10 : vector<16x128xf32>
    %16 = arith.addf %14, %15 : vector<16x128xf32>
    %cst_5 = arith.constant 1.000000e+00 : f32
    %17 = vector.broadcast %cst_5 : f32 to vector<16x128xf32>
    %18 = arith.addf %17, %10 : vector<16x128xf32>
    %19 = tpu.reciprocal %18 {approx = true} : vector<16x128xf32> -> vector<16x128xf32>
    %20 = arith.mulf %18, %19 : vector<16x128xf32>
    %cst_6 = arith.constant 2.000000e+00 : f32
    %21 = vector.broadcast %cst_6 : f32 to vector<16x128xf32>
    %22 = arith.subf %21, %20 : vector<16x128xf32>
    %23 = arith.mulf %19, %22 : vector<16x128xf32>
    %cst_7 = arith.constant 0.000000e+00 : f32
    %24 = vector.broadcast %cst_7 : f32 to vector<16x128xf32>
    %25 = arith.cmpf oge, %5, %24 : vector<16x128xf32>
    %26 = arith.mulf %10, %23 : vector<16x128xf32>
    %27 = arith.select %25, %23, %26 : vector<16x128xi1>, vector<16x128xf32>
    %cst_8 = arith.constant -5.000000e-01 : f32
    %28 = vector.broadcast %cst_8 : f32 to vector<16x128xf32>
    %29 = arith.mulf %6, %28 : vector<16x128xf32>
    %cst_9 = arith.constant 7.500000e-01 : f32
    %30 = vector.broadcast %cst_9 : f32 to vector<16x128xf32>
    %31 = arith.addf %30, %29 : vector<16x128xf32>
    %32 = arith.addf %6, %27 : vector<16x128xf32>
    %cst_10 = arith.constant 2.000000e+00 : f32
    %33 = vector.broadcast %cst_10 : f32 to vector<16x128xf32>
    %34 = arith.mulf %33, %6 : vector<16x128xf32>
    %35 = arith.mulf %34, %27 : vector<16x128xf32>
    %36 = arith.subf %32, %35 : vector<16x128xf32>
    %cst_11 = arith.constant 0.000000e+00 : f32
    %37 = vector.broadcast %cst_11 : f32 to vector<16x128xf32>
    %38 = arith.maximumf %36, %37 : vector<16x128xf32>
    %39 = arith.mulf %16, %31 : vector<16x128xf32>
    %40 = math.sqrt %38 : vector<16x128xf32>
    %41 = arith.mulf %38, %40 : vector<16x128xf32>
    %42 = arith.mulf %39, %41 : vector<16x128xf32>
    %c1_i32_12 = arith.constant 1 : i32
    %43 = arith.addi %1, %c1_i32_12 : i32
    %c16_i32 = arith.constant 16 : i32
    %44 = arith.muli %43, %c16_i32 : i32
    %c16_i32_13 = arith.constant 16 : i32
    %45 = arith.cmpi sgt, %44, %c16_i32_13 : i32
    %46 = arith.extui %45 : i1 to i32
    %c0_i32_14 = arith.constant 0 : i32
    %47 = arith.cmpi ne, %46, %c0_i32_14 : i32
    scf.if %47 {
      %51 = tpu.iota {dimensions = array<i32: 0>} : vector<16x128xi32>
      %c16_i32_16 = arith.constant 16 : i32
      %52 = arith.muli %1, %c16_i32_16 : i32
      %53 = vector.broadcast %52 : i32 to vector<16x128xi32>
      %54 = arith.addi %53, %51 : vector<16x128xi32>
      %c16_i32_17 = arith.constant 16 : i32
      %55 = vector.broadcast %c16_i32_17 : i32 to vector<16x128xi32>
      %56 = arith.cmpi slt, %54, %55 : vector<16x128xi32>
      %cst_18 = arith.constant 0.000000e+00 : f32
      %57 = vector.broadcast %cst_18 : f32 to vector<16x128xf32>
      %58 = arith.select %56, %42, %57 : vector<16x128xi1>, vector<16x128xf32>
      %59 = vector.shape_cast %58 : vector<16x128xf32> to vector<2x8x128xf32>
      %cst_19 = arith.constant dense<0.000000e+00> : vector<8x128xf32>
      %60 = vector.multi_reduction <add>, %59, %cst_19 [0] : vector<2x8x128xf32> to vector<8x128xf32>
      %c0_20 = arith.constant 0 : index
      %c0_21 = arith.constant 0 : index
      %c0_22 = arith.constant 0 : index
      %61 = vector.load %arg4[%c0_20, %c0_21, %c0_22] : memref<1x8x128xf32, #tpu.memory_space<vmem>>, vector<1x8x128xf32>
      %62 = vector.shape_cast %60 : vector<8x128xf32> to vector<1x8x128xf32>
      %63 = arith.addf %61, %62 : vector<1x8x128xf32>
      %c0_23 = arith.constant 0 : index
      %c0_24 = arith.constant 0 : index
      %c0_25 = arith.constant 0 : index
      %64 = vector.load %arg4[%c0_23, %c0_24, %c0_25] : memref<1x8x128xf32, #tpu.memory_space<vmem>>, vector<1x8x128xf32>
      tpu.vector_store %arg4[%c0_23, %c0_24, %c0_25], %63 {strides = array<i32>} : memref<1x8x128xf32, #tpu.memory_space<vmem>>, vector<1x8x128xf32>,
    } else {
    }
    %true = arith.constant true
    %48 = arith.xori %45, %true : i1
    %49 = arith.extui %48 : i1 to i32
    %c0_i32_15 = arith.constant 0 : i32
    %50 = arith.cmpi ne, %49, %c0_i32_15 : i32
    scf.if %50 {
      %51 = vector.shape_cast %42 : vector<16x128xf32> to vector<2x8x128xf32>
      %cst_16 = arith.constant dense<0.000000e+00> : vector<8x128xf32>
      %52 = vector.multi_reduction <add>, %51, %cst_16 [0] : vector<2x8x128xf32> to vector<8x128xf32>
      %c0_17 = arith.constant 0 : index
      %c0_18 = arith.constant 0 : index
      %c0_19 = arith.constant 0 : index
      %53 = vector.load %arg4[%c0_17, %c0_18, %c0_19] : memref<1x8x128xf32, #tpu.memory_space<vmem>>, vector<1x8x128xf32>
      %54 = vector.shape_cast %52 : vector<8x128xf32> to vector<1x8x128xf32>
      %55 = arith.addf %53, %54 : vector<1x8x128xf32>
      %c0_20 = arith.constant 0 : index
      %c0_21 = arith.constant 0 : index
      %c0_22 = arith.constant 0 : index
      %56 = vector.load %arg4[%c0_20, %c0_21, %c0_22] : memref<1x8x128xf32, #tpu.memory_space<vmem>>, vector<1x8x128xf32>
      tpu.vector_store %arg4[%c0_20, %c0_21, %c0_22], %55 {strides = array<i32>} : memref<1x8x128xf32, #tpu.memory_space<vmem>>, vector<1x8x128xf32>,
    } else {
    }
    return
  }
  func.func @transform_0(%arg0: i32, %arg1: i32) -> (i32, i32) {
    %c1_i32 = arith.constant 1 : i32
    %0 = arith.muli %arg0, %c1_i32 : i32
    %1 = arith.addi %0, %arg1 : i32
    %c0_i32 = arith.constant 0 : i32
    %c0_i32_0 = arith.constant 0 : i32
    return %1, %c0_i32 : i32, i32
  }
  func.func @transform_1(%arg0: i32, %arg1: i32) -> (i32, i32) {
    %c1_i32 = arith.constant 1 : i32
    %0 = arith.muli %arg0, %c1_i32 : i32
    %1 = arith.addi %0, %arg1 : i32
    %c0_i32 = arith.constant 0 : i32
    %c0_i32_0 = arith.constant 0 : i32
    return %1, %c0_i32 : i32, i32
  }
  func.func @transform_2(%arg0: i32, %arg1: i32) -> (i32, i32, i32) {
    %c0_i32 = arith.constant 0 : i32
    %c0_i32_0 = arith.constant 0 : i32
    %c0_i32_1 = arith.constant 0 : i32
    return %arg0, %c0_i32, %c0_i32_0 : i32, i32, i32
  }
}

</mosaic_0001>

<bundles_post_ra>
// kernel: tpu_custom_call.1
= control target key start
LH: loop header
LB: loop body
LE: loop exit
PB: predicated region body
PF: predicated region fallthrough
CT: control target
= control target key end

     0   :  { %7 = vsyncpa [#allocation3], 0  ;;  %s353_s0 = inlined_call_operand.hbm [shape: f32[16,128], index: 0, kind: input, shape index: {}]   ;;  %s354_s1 = inlined_call_operand.hbm [shape: f32[16,128], index: 1, kind: input, shape index: {}]   ;;  %s355_s2 = inlined_call_operand.hbm [shape: f32[1,8,128], index: 2, kind: output, shape index: {}]  }
   0x1   :  { %8 = vsyncpa [#allocation6], 0 }
   0x2   :  { %9 = vsyncpa [#allocation4], 0  ;;  %s285_s9 = smov [#allocation2]   ;;  %s213_s13 = scalar_lea.hbm %s353_s0, 256 }
   0x3   :  { %s19_s10 = sshll.u32 %s285_s9, 4  ;;  %p214_p0 = scmp.ne.s32.totalorder %s353_s0, %s213_s13  ;;  %s20_s10 = int_to_ptr.vmem [resolvable:$true] %s19_s10 }
   0x4   :  { %p217_p1 = scmp.lt.u32.totalorder %s213_s13, %s353_s0 }
   0x6   :  { %p219_p2 = pnand %p217_p1, %p214_p0 }
   0x8   :  { %222 = shalt.err (!%p219_p2)
}
   0x9   :  { %s223_s18 = scalar_lea.vmem %s20_s10, 256  ;;  %p228_p4 = scmp.lt.s32.totalorder %s20_s10, %s20_s10 }
   0xa   :  { %p224_p3 = scmp.ne.s32.totalorder %s20_s10, %s223_s18  ;;  %p229_p5 = scmp.lt.s32.totalorder %s223_s18, %s223_s18 }
   0xc   :  { %p230_p6 = por %p229_p5, %p228_p4 }
   0xe   :  { %p231_p7 = pnand %p230_p6, %p224_p3 }
  0x10   :  { %234 = shalt.err (!%p231_p7)
}
  0x11   :  { %s286_s19 = smov 128   ;;  %s287_s20 = smov 8  }
  0x12   :  { %25 = dma.hbm_to_vmem [thread:$0]  %s353_s0, 256, %s20_s10, [#allocation3], %s286_s19, %s286_s19, %s287_s20  }
  0x13   :  { %s288_s23 = smov [#allocation5]   ;;  %s235_s27 = scalar_lea.hbm %s354_s1, 256 }
  0x14   :  { %s35_s24 = sshll.u32 %s288_s23, 4  ;;  %p236_p8 = scmp.ne.s32.totalorder %s354_s1, %s235_s27  ;;  %s36_s24 = int_to_ptr.vmem [resolvable:$true] %s35_s24 }
  0x15   :  { %p239_p9 = scmp.lt.u32.totalorder %s235_s27, %s354_s1 }
  0x17   :  { %p241_p10 = pnand %p239_p9, %p236_p8 }
  0x19   :  { %244 = shalt.err (!%p241_p10)
}
  0x1a   :  { %s245_s4 = scalar_lea.vmem %s36_s24, 256  ;;  %p250_p12 = scmp.lt.s32.totalorder %s36_s24, %s36_s24 }
  0x1b   :  { %p246_p11 = scmp.ne.s32.totalorder %s36_s24, %s245_s4  ;;  %p251_p13 = scmp.lt.s32.totalorder %s245_s4, %s245_s4 }
  0x1d   :  { %p252_p0 = por %p251_p13, %p250_p12 }
  0x1f   :  { %p253_p1 = pnand %p252_p0, %p246_p11 }
  0x21   :  { %256 = shalt.err (!%p253_p1)
}
  0x22   :  { %41 = dma.hbm_to_vmem [thread:$0]  %s354_s1, 256, %s36_s24, [#allocation6], %s286_s19, %s286_s19, %s287_s20  }
  0x23   :  { %279 = dma.done.wait [#allocation3], 256  }
  0x24   :  { %280 = vsyncadd [#allocation3], 4294967040 }
  0x25   :  { %281 = dma.done.wait [#allocation6], 256  }
  0x26   :  { %282 = vsyncadd [#allocation6], 4294967040  ;;  %v329_v0 = vld [vmem:[#allocation2] sm:$0xff]  ;;  %v331_v1 = vld [vmem:[#allocation2 + $0x8] sm:$0xff]  ;;  %s289_s1 = smov [#allocation7]  }
  0x27   :  { %v62_v2 = vand.u32 2147483647, %v329_v0  ;;  %v63_v3 = vand.u32 2147483647, %v331_v1  ;;  %v60_v16 = vld [vmem:[#allocation5] sm:$0xff]  ;;  %v61_v18 = vld [vmem:[#allocation5 + $0x8] sm:$0xff] }
  0x28   :  { %vm106_vm0 = vcmp.ge.f32.partialorder %v329_v0, 0.0  ;;  %v118_v22 = vmul.f32 2.0, %v60_v16  ;;  %vm107_vm1 = vcmp.ge.f32.partialorder %v331_v1, 0.0  ;;  %v119_v24 = vmul.f32 2.0, %v61_v18  ;;  %s181_s6 = sshll.u32 %s289_s1, 4  ;;  %s182_s6 = int_to_ptr.vmem [resolvable:$true] %s181_s6 }
  0x29   :  { %v64_v4 = vsub.f32 0.0, %v62_v2  ;;  %v65_v5 = vsub.f32 0.0, %v63_v3  ;;  %v70_v44 = vmax.f32 %v329_v0, 0.0  ;;  %v72_v45 = vmul.f32 %v60_v16, %v329_v0  ;;  %s257_s7 = scalar_lea.vmem %s182_s6, 128  ;;  %p262_p3 = scmp.lt.s32.totalorder %s182_s6, %s182_s6 }
  0x2a   :  { %v71_v46 = vmax.f32 %v331_v1, 0.0  ;;  %v73_v47 = vmul.f32 %v61_v18, %v331_v1  ;;  %v112_v53 = vmul.f32 -0.5, %v60_v16  ;;  %v113_v56 = vmul.f32 -0.5, %v61_v18  ;;  %p258_p2 = scmp.ne.s32.totalorder %s182_s6, %s257_s7  ;;  %p263_p4 = scmp.lt.s32.totalorder %s257_s7, %s257_s7 }
  0x2b   :  { %v66_v6 = vmul.f32 1.442695, %v64_v4  ;;  %v68_v7 = vmul.f32 1.442695, %v65_v5  ;;  %v74_v52 = vsub.f32 %v70_v44, %v72_v45 }
  0x2c   :  { %v75_v54 = vsub.f32 %v71_v46, %v73_v47  ;;  %v114_v59 = vadd.f32 0.75, %v112_v53  ;;  %v115_v62 = vadd.f32 0.75, %v113_v56  ;;  %p264_p5 = por %p263_p4, %p262_p3 }
  0x2d   :  { %197 = vpow2.f32 %v66_v6 }
  0x2e   :  { %199 = vpow2.f32 %v68_v7  ;;  %p265_p6 = pnand %p264_p5, %p258_p2 }
  0x37   :  { %v198_v8 = vpop.eup %197 }
  0x38   :  { %v200_v9 = vpop.eup %199  ;;  %v76_v10 = vadd.f32 1.0, %v198_v8  ;;  %v79_v27 = vmul.f32 -0.5, %v198_v8  ;;  %v82_v39 = vand.u32 2147483647, %v198_v8 }
  0x39   :  { %v85_v11 = vadd.f32 1.0, %v200_v9  ;;  %v88_v31 = vmul.f32 -0.5, %v200_v9  ;;  %v91_v43 = vand.u32 2147483647, %v200_v9 }
  0x3a   :  { %201 = vrcp.f32 %v76_v10  ;;  %v80_v36 = vadd.f32 1.0, %v79_v27  ;;  %vm83_vm2 = vcmp.lt.f32.partialorder %v82_v39, 0.0004427343 }
  0x3b   :  { %203 = vrcp.f32 %v85_v11  ;;  %v89_v40 = vadd.f32 1.0, %v88_v31  ;;  %vm92_vm3 = vcmp.lt.f32.partialorder %v91_v43, 0.0004427343 }
  0x3c   :  { %205 = vlog2.f32 %v76_v10  ;;  %v81_v49 = vmul.f32 %v198_v8, %v80_v36 }
  0x3d   :  { %207 = vlog2.f32 %v85_v11  ;;  %v90_v51 = vmul.f32 %v200_v9, %v89_v40 }
  0x44   :  { %v202_v12 = vpop.eup %201 }
  0x45   :  { %v204_v13 = vpop.eup %203  ;;  %v100_v14 = vmul.f32 %v202_v12, %v76_v10 }
  0x46   :  { %v101_v15 = vmul.f32 %v204_v13, %v85_v11  ;;  %v206_v38 = vpop.eup %205 }
  0x47   :  { %v102_v17 = vsub.f32 2.0, %v100_v14  ;;  %v208_v42 = vpop.eup %207  ;;  %v78_v48 = vmul.f32 0.6931472, %v206_v38 }
  0x48   :  { %v103_v19 = vsub.f32 2.0, %v101_v15  ;;  %v87_v50 = vmul.f32 0.6931472, %v208_v42 }
  0x49   :  { %v104_v20 = vmul.f32 %v202_v12, %v102_v17  ;;  %v84_v55 = vsel %vm83_vm2, %v81_v49, %v78_v48 }
  0x4a   :  { %v105_v21 = vmul.f32 %v204_v13, %v103_v19  ;;  %v93_v57 = vsel %vm92_vm3, %v90_v51, %v87_v50  ;;  %v94_v58 = vadd.f32 %v84_v55, %v74_v52 }
  0x4b   :  { %v108_v23 = vmul.f32 %v198_v8, %v104_v20  ;;  %v95_v61 = vadd.f32 %v93_v57, %v75_v54 }
  0x4c   :  { %v109_v25 = vmul.f32 %v200_v9, %v105_v21  ;;  %v126_v4 = vmul.f32 %v114_v59, %v94_v58 }
  0x4d   :  { %v110_v26 = vsel %vm106_vm0, %v104_v20, %v108_v23  ;;  %v127_v6 = vmul.f32 %v115_v62, %v95_v61 }
  0x4e   :  { %v111_v28 = vsel %vm107_vm1, %v105_v21, %v109_v25  ;;  %v116_v29 = vadd.f32 %v110_v26, %v60_v16  ;;  %v120_v30 = vmul.f32 %v118_v22, %v110_v26 }
  0x4f   :  { %v117_v32 = vadd.f32 %v111_v28, %v61_v18  ;;  %v121_v33 = vmul.f32 %v119_v24, %v111_v28 }
  0x50   :  { %v122_v34 = vsub.f32 %v116_v29, %v120_v30 }
  0x51   :  { %v123_v35 = vsub.f32 %v117_v32, %v121_v33 }
  0x52   :  { %v124_v37 = vmax.f32 %v122_v34, 0.0 }
  0x53   :  { %v125_v41 = vmax.f32 %v123_v35, 0.0 }
  0x54   :  { %209 = vrsqrt.f32 %v124_v37  ;;  %vm130_vm4 = vcmp.eq.f32.partialorder %v124_v37, inf  ;;  %v133_v63 = vand.u32 2147483648, %v124_v37  ;;  %vm132_vm5 = vcmp.eq.f32.partialorder %v124_v37, 0.0 }
  0x55   :  { %211 = vrsqrt.f32 %v125_v41  ;;  %vm137_vm6 = vcmp.eq.f32.partialorder %v125_v41, inf  ;;  %v140_v2 = vand.u32 2147483648, %v125_v41  ;;  %vm139_vm7 = vcmp.eq.f32.partialorder %v125_v41, 0.0 }
  0x5e   :  { %v210_v60 = vpop.eup %209 }
  0x5f   :  { %v212_v0 = vpop.eup %211  ;;  %v129_v1 = vmul.f32 %v210_v60, %v124_v37 }
  0x60   :  { %v136_v3 = vmul.f32 %v212_v0, %v125_v41 }
  0x61   :  { %v131_v5 = vsel %vm130_vm4, %v124_v37, %v129_v1 }
  0x62   :  { %v134_v7 = vsel %vm132_vm5, %v133_v63, %v131_v5  ;;  %v138_v8 = vsel %vm137_vm6, %v125_v41, %v136_v3 }
  0x63   :  { %v141_v9 = vsel %vm139_vm7, %v140_v2, %v138_v8  ;;  %v142_v10 = vmul.f32 %v134_v7, %v124_v37 }
  0x64   :  { %v143_v11 = vmul.f32 %v141_v9, %v125_v41 }
  0x65   :  { %v144_v12 = vmul.f32 %v142_v10, %v126_v4 }
  0x66   :  { %v145_v13 = vmul.f32 %v143_v11, %v127_v6 }
  0x68   :  { %v171_v14 = vadd.f32 %v145_v13, %v144_v12 }
  0x6a   :  { %174 = vst [vmem:[#allocation7] sm:$0xff] %v171_v14 }
  0x6b   :  { %268 = shalt.err (!%p265_p6)
}
  0x6c   :  { %s269_s10 = scalar_lea.hbm %s355_s2, 128 }
  0x6d   :  { %p270_p7 = scmp.ne.s32.totalorder %s355_s2, %s269_s10  ;;  %p273_p8 = scmp.lt.u32.totalorder %s269_s10, %s355_s2 }
  0x6f   :  { %p275_p9 = pnand %p273_p8, %p270_p7 }
  0x71   :  { %278 = shalt.err (!%p275_p9)
}
  0x72   :  { %184 = dma.vmem_to_hbm [thread:$0]  %s182_s6, 128, %s355_s2, [#allocation4]  }
  0x73   :  { %283 = dma.done.wait [#allocation4], 128  }
  0x74   :  { %284 = vsyncadd [#allocation4], 4294967168 }
  0x75   :  { %188 = vsyncpa [#allocation3], 1 }
  0x76   :  { %189 = vsyncpa [#allocation6], 1 }
  0x77   :  { %190 = vsyncpa [#allocation4], 1 }

</bundles_post_ra>
